<compile_context>
chip_gen: v7x
topology: tpu7x:2x2x1
jax: 0.10.0
libtpu: 0.0.40
codegen_flags: <defaults>
</compile_context>

<pallas_src>
import functools

import jax
import jax.numpy as jnp
from jax.experimental import pallas as pl
from jax.experimental.pallas import tpu as pltpu


# Scoped VMEM limit: safe on v5e/v6e (128 MiB physical) and v7x (64 MiB).
_VMEM_LIMIT = 48 * 1024 * 1024
# Working-set budget for the fused path (in-dbuf + out-dbuf + f32 temp).
_FUSED_BUDGET = 40 * 1024 * 1024
# Per-stream-buffer target for the streaming fallback path.
_STREAM_BUF_BYTES = 8 * 1024 * 1024


# ---------------------------------------------------------------------------
# Fused kernel: squeeze + excite + rescale on a group of whole batches.
# ---------------------------------------------------------------------------
def _se_fused_kernel(x_ref, w1_ref, b1_ref, w2_ref, b2_ref, o_ref):
    x = x_ref[...]                                            # (bb, C, HW), input dtype
    m = jnp.mean(x.astype(jnp.float32), axis=-1)              # (bb, C) f32
    h = jnp.dot(m, w1_ref[...], preferred_element_type=jnp.float32) + b1_ref[...]
    h = jnp.maximum(h, 0.0)                                   # (bb, Cr)
    s = jax.nn.sigmoid(
        jnp.dot(h, w2_ref[...], preferred_element_type=jnp.float32) + b2_ref[...]
    )                                                         # (bb, C) f32
    # Multiply in x's dtype (matches reference: gate cast to x.dtype first).
    o_ref[...] = x * s[:, :, None].astype(x.dtype)


# ---------------------------------------------------------------------------
# Streaming pass 1: tiled squeeze (global average pool over HW).
# Per-step accumulation is VPU-only (aligned 128-lane chunk adds into a
# (t_r, 128) f32 accumulator); the cross-lane reduce runs once at the end.
# ---------------------------------------------------------------------------
def _squeeze_kernel(x_ref, mean_ref, acc_ref, *, hw, t_hw, grid_h):
    h = pl.program_id(1)

    @pl.when(h == 0)
    def _():
        acc_ref[...] = jnp.zeros_like(acc_ref)

    chunk = acc_ref.shape[-1]            # min(t_hw, 128)
    n_chunks = t_hw // chunk

    def _accum(valid_in_tile):
        # valid_in_tile: static number of valid lanes inside this HW tile.
        acc = acc_ref[...]
        for c in range(n_chunks):
            lo = c * chunk
            if lo >= valid_in_tile:
                break                                       # trace-time skip
            v = x_ref[:, lo:lo + chunk].astype(jnp.float32)
            n_valid = min(chunk, valid_in_tile - lo)
            if n_valid < chunk:
                lane = jax.lax.broadcasted_iota(jnp.int32, v.shape, 1)
                v = jnp.where(lane < n_valid, v, 0.0)
            acc = acc + v
        acc_ref[...] = acc

    # Valid lanes in the last HW tile (static).  Ragged => grid_h >= 2.
    tail = hw - (grid_h - 1) * t_hw
    if tail == t_hw:
        _accum(t_hw)                     # every tile is full: no masking at all
    else:
        @pl.when(h < grid_h - 1)
        def _():
            _accum(t_hw)                 # full tiles: unmasked fast path

        @pl.when(h == grid_h - 1)
        def _():
            _accum(tail)                 # only the last tile pays for masking

    @pl.when(h == grid_h - 1)
    def _():
        mean_ref[...] = (jnp.sum(acc_ref[...], axis=-1, keepdims=True)
                         * (1.0 / hw))


# ---------------------------------------------------------------------------
# Streaming pass 2: excitation (fc1 -> ReLU -> fc2 -> sigmoid). Tiny, resident.
# ---------------------------------------------------------------------------
def _excite_kernel(m_ref, w1_ref, b1_ref, w2_ref, b2_ref, s_ref):
    m = m_ref[...]                                            # (B, C) f32
    h = jnp.dot(m, w1_ref[...], preferred_element_type=jnp.float32) + b1_ref[...]
    h = jnp.maximum(h, 0.0)
    s = jnp.dot(h, w2_ref[...], preferred_element_type=jnp.float32) + b2_ref[...]
    s_ref[...] = jax.nn.sigmoid(s)                            # (B, C)


# ---------------------------------------------------------------------------
# Streaming pass 3: tiled channel-wise rescale.
# ---------------------------------------------------------------------------
def _rescale_kernel(x_ref, s_ref, o_ref):
    # Multiply in the output dtype (bf16 multiply stays native on v6e/v7x and
    # matches the reference, which casts the gate to x.dtype before the mul).
    o_ref[...] = x_ref[...] * s_ref[...].astype(o_ref.dtype)


# ---------------------------------------------------------------------------
# Tiling helpers.
# ---------------------------------------------------------------------------
def _pick_stream_tiles(rows, hw, dtype_bytes):
    """Lane-dense tiles (~8 MiB/buffer) that respect the (8, 128) block rule."""
    if hw < 128:
        t_hw = hw                                   # full dim -> always legal
    else:
        t_hw = (min(hw, 4096) // 128) * 128         # multiple of 128
    max_rows = (_STREAM_BUF_BYTES // (t_hw * dtype_bytes)) // 8 * 8
    max_rows = max(8, min(512, max_rows))           # multiple of 8, bounded
    t_r = rows if rows <= max_rows else max_rows    # full dim OR capped mult-of-8
    return t_r, t_hw


def _largest_divisor_leq(n, cap):
    cap = max(1, min(n, cap))
    for d in range(cap, 0, -1):
        if n % d == 0:
            return d
    return 1


# ---------------------------------------------------------------------------
# Forward.
# ---------------------------------------------------------------------------
def se_forward(x_nchw, w1, b1, w2, b2, *, force_streaming=False):
    """SE block forward. x_nchw: (B, C, H, W). w1: (Cr, C), w2: (C, Cr)."""
    B, C, H, W = x_nchw.shape
    HW = H * W
    BC = B * C
    Cr = w1.shape[0]
    dtype = x_nchw.dtype
    d_bytes = jnp.dtype(dtype).itemsize

    w1t = jnp.asarray(w1, jnp.float32).T          # (C, Cr)
    w2t = jnp.asarray(w2, jnp.float32).T          # (Cr, C)
    b1r = jnp.asarray(b1, jnp.float32).reshape(1, Cr)
    b2r = jnp.asarray(b2, jnp.float32).reshape(1, C)

    # Fused-path budget: double-buffered input + output blocks + f32 temp.
    per_batch_ws = C * HW * (4 * d_bytes + 4)
    bb_max = _FUSED_BUDGET // max(per_batch_ws, 1)

    # ---------------- fused path: 1 read + 1 write of x --------------------
    if (not force_streaming) and bb_max >= 1:
        bb = _largest_divisor_leq(B, bb_max)      # whole batches, divides B
        x3 = x_nchw.reshape(B, C, HW)
        out3 = pl.pallas_call(
            _se_fused_kernel,
            out_shape=jax.ShapeDtypeStruct((B, C, HW), dtype),
            grid_spec=pltpu.PrefetchScalarGridSpec(
                num_scalar_prefetch=0,
                grid=(B // bb,),
                in_specs=[
                    pl.BlockSpec((bb, C, HW), lambda b: (b, 0, 0)),
                    pl.BlockSpec((C, Cr), lambda b: (0, 0)),
                    pl.BlockSpec((1, Cr), lambda b: (0, 0)),
                    pl.BlockSpec((Cr, C), lambda b: (0, 0)),
                    pl.BlockSpec((1, C), lambda b: (0, 0)),
                ],
                out_specs=pl.BlockSpec((bb, C, HW), lambda b: (b, 0, 0)),
            ),
            compiler_params=pltpu.CompilerParams(
                dimension_semantics=("parallel",),
                vmem_limit_bytes=_VMEM_LIMIT,
            ),
            cost_estimate=pl.CostEstimate(
                flops=2 * B * C * HW + 4 * B * C * Cr,
                transcendentals=B * C,
                bytes_accessed=2 * B * C * HW * d_bytes,
            ),
        )(x3, w1t, b1r, w2t, b2r)
        return out3.reshape(B, C, H, W)

    # ---------------- streaming fallback: 3 passes --------------------------
    x2 = x_nchw.reshape(BC, HW)
    t_r, t_hw = _pick_stream_tiles(BC, HW, d_bytes)
    grid_r = pl.cdiv(BC, t_r)
    grid_h = pl.cdiv(HW, t_hw)
    chunk = min(t_hw, 128)

    # pass 1: squeeze (f32 accumulation).  Padded rows of a ragged last row
    # tile read undefined VMEM -- safe: per-row reduction, padded rows dropped.
    mean_col = pl.pallas_call(
        functools.partial(_squeeze_kernel, hw=HW, t_hw=t_hw, grid_h=grid_h),
        out_shape=jax.ShapeDtypeStruct((BC, 1), jnp.float32),
        grid_spec=pltpu.PrefetchScalarGridSpec(
            num_scalar_prefetch=0,
            grid=(grid_r, grid_h),
            in_specs=[pl.BlockSpec((t_r, t_hw), lambda r, h: (r, h))],
            out_specs=pl.BlockSpec((t_r, 1), lambda r, h: (r, 0)),
            scratch_shapes=[pltpu.VMEM((t_r, chunk), jnp.float32)],
        ),
        compiler_params=pltpu.CompilerParams(
            dimension_semantics=("parallel", "arbitrary"),
            vmem_limit_bytes=_VMEM_LIMIT,
        ),
        cost_estimate=pl.CostEstimate(
            flops=BC * HW, transcendentals=0,
            bytes_accessed=BC * HW * d_bytes + BC * 4,
        ),
    )(x2)

    # pass 2: excitation (tiny, no grid).  Kept separate only on this fallback
    # path; its launch cost is noise next to the huge streaming passes.
    s = pl.pallas_call(
        _excite_kernel,
        out_shape=jax.ShapeDtypeStruct((B, C), jnp.float32),
        in_specs=[pl.BlockSpec(memory_space=pltpu.MemorySpace.VMEM)] * 5,
        out_specs=pl.BlockSpec(memory_space=pltpu.MemorySpace.VMEM),
        cost_estimate=pl.CostEstimate(
            flops=4 * B * C * Cr, transcendentals=B * C,
            bytes_accessed=(B * C + 2 * C * Cr + C + Cr) * 4,
        ),
    )(mean_col.reshape(B, C), w1t, b1r, w2t, b2r)

    s_col = s.reshape(BC, 1)                      # per-(b, c) gate, f32

    # pass 3: rescale (lane-dense output tiles, unmasked stores).
    out2 = pl.pallas_call(
        _rescale_kernel,
        out_shape=jax.ShapeDtypeStruct((BC, HW), dtype),
        grid_spec=pltpu.PrefetchScalarGridSpec(
            num_scalar_prefetch=0,
            grid=(grid_r, grid_h),
            in_specs=[pl.BlockSpec((t_r, t_hw), lambda r, h: (r, h)),
                      pl.BlockSpec((t_r, 1), lambda r, h: (r, 0))],
            out_specs=pl.BlockSpec((t_r, t_hw), lambda r, h: (r, h)),
        ),
        compiler_params=pltpu.CompilerParams(
            dimension_semantics=("parallel", "parallel"),
            vmem_limit_bytes=_VMEM_LIMIT,
        ),
        cost_estimate=pl.CostEstimate(
            flops=BC * HW, transcendentals=0,
            bytes_accessed=2 * BC * HW * d_bytes + BC * 4,
        ),
    )(x2, s_col)

    return out2.reshape(B, C, H, W)


def se_reference(x_nchw, w1, b1, w2, b2):
    """Pure-JAX reference matching the PyTorch module semantics."""
    B, C, H, W = x_nchw.shape
    sq = x_nchw.reshape(B, C, -1).astype(jnp.float32).mean(axis=2)
    h = jax.nn.relu(sq @ w1.T + b1)
    s = jax.nn.sigmoid(h @ w2.T + b2)
    return x_nchw * s.reshape(B, C, 1, 1).astype(x_nchw.dtype)


if __name__ == "__main__":
    def run_case(B, C, H, W, reduction_ratio, key, force_streaming):
        Cr = max(C // reduction_ratio, 1)
        kx, kw1, kb1, kw2, kb2 = jax.random.split(key, 5)
        x = jax.random.normal(kx, (B, C, H, W), dtype=jnp.float32)

        bound1 = 1.0 / jnp.sqrt(C)
        w1 = jax.random.uniform(kw1, (Cr, C), minval=-bound1, maxval=bound1,
                                dtype=jnp.float32)
        b1 = jax.random.uniform(kb1, (Cr,), minval=-bound1, maxval=bound1,
                                dtype=jnp.float32)
        bound2 = 1.0 / jnp.sqrt(Cr)
        w2 = jax.random.uniform(kw2, (C, Cr), minval=-bound2, maxval=bound2,
                                dtype=jnp.float32)
        b2 = jax.random.uniform(kb2, (C,), minval=-bound2, maxval=bound2,
                                dtype=jnp.float32)

        out = jax.block_until_ready(
            se_forward(x, w1, b1, w2, b2, force_streaming=force_streaming))
        ref = se_reference(x, w1, b1, w2, b2)
        assert out.shape == (B, C, H, W)
        assert jnp.allclose(out, ref, atol=1e-5, rtol=1e-5), \
            f"mismatch vs reference for shape {(B, C, H, W)} " \
            f"(force_streaming={force_streaming})"

    key = jax.random.PRNGKey(0)
    k1, k2, k3, k4 = jax.random.split(key, 4)
    run_case(2, 4, 16, 16, 2, k1, force_streaming=False)  # fused path
    run_case(2, 4, 9, 15, 2, k2, force_streaming=False)   # fused, ragged HW
    run_case(2, 4, 16, 16, 2, k3, force_streaming=True)   # streaming fallback
    run_case(2, 4, 9, 15, 2, k4, force_streaming=True)    # streaming, ragged tail masking

    print("KERNEL_OK")
</pallas_src>

<mosaic_0001>
module attributes {stable_mosaic.version = 11 : i64} {
  func.func @_se_fused_kernel(%arg0: i32, %arg1: memref<2x4x256xf32, #tpu.memory_space<vmem>>, %arg2: memref<4x2xf32, #tpu.memory_space<vmem>>, %arg3: memref<1x2xf32, #tpu.memory_space<vmem>>, %arg4: memref<2x4xf32, #tpu.memory_space<vmem>>, %arg5: memref<1x4xf32, #tpu.memory_space<vmem>>, %arg6: memref<2x4x256xf32, #tpu.memory_space<vmem>>) attributes {dimension_semantics = [#tpu.dimension_semantics<parallel>], iteration_bounds = array<i64: 1>, scalar_prefetch = 0 : i64, scratch_operands = 0 : i64, tpu.core_type = #tpu.core_type<tc>, window_params = [{transform_indices = @transform_0, window_bounds = array<i64: 2, 4, 256>}, {pipeline_mode = #tpu.pipeline_mode<synchronous>, transform_indices = @transform_1, window_bounds = array<i64: 4, 2>}, {pipeline_mode = #tpu.pipeline_mode<synchronous>, transform_indices = @transform_2, window_bounds = array<i64: 1, 2>}, {pipeline_mode = #tpu.pipeline_mode<synchronous>, transform_indices = @transform_3, window_bounds = array<i64: 2, 4>}, {pipeline_mode = #tpu.pipeline_mode<synchronous>, transform_indices = @transform_4, window_bounds = array<i64: 1, 4>}, {transform_indices = @transform_5, window_bounds = array<i64: 2, 4, 256>}]} {
    %c0 = arith.constant 0 : index
    %c0_0 = arith.constant 0 : index
    %c0_1 = arith.constant 0 : index
    %0 = vector.load %arg1[%c0, %c0_0, %c0_1] : memref<2x4x256xf32, #tpu.memory_space<vmem>>, vector<2x4x256xf32>
    %cst = arith.constant dense<0.000000e+00> : vector<2x4xf32>
    %1 = vector.multi_reduction <add>, %0, %cst [2] : vector<2x4x256xf32> to vector<2x4xf32>
    %cst_2 = arith.constant 2.560000e+02 : f32
    %2 = vector.broadcast %cst_2 : f32 to vector<2x4xf32>
    %3 = arith.divf %1, %2 : vector<2x4xf32>
    %c0_3 = arith.constant 0 : index
    %c0_4 = arith.constant 0 : index
    %4 = vector.load %arg2[%c0_3, %c0_4] : memref<4x2xf32, #tpu.memory_space<vmem>>, vector<4x2xf32>
    %cst_5 = arith.constant dense<0.000000e+00> : vector<2x2xf32>
    %5 = tpu.matmul %3, %4, %cst_5 {dimension_numbers = #tpu.dot_dimension_numbers<[1], [0], [0], [1], [0, 0, 1, 1], [], []>} : vector<2x4xf32>, vector<4x2xf32>, vector<2x2xf32> -> vector<2x2xf32>
    %c0_6 = arith.constant 0 : index
    %c0_7 = arith.constant 0 : index
    %6 = vector.load %arg3[%c0_6, %c0_7] : memref<1x2xf32, #tpu.memory_space<vmem>>, vector<1x2xf32>
    %7 = vector.broadcast %6 : vector<1x2xf32> to vector<2x2xf32>
    %8 = arith.addf %5, %7 : vector<2x2xf32>
    %cst_8 = arith.constant 0.000000e+00 : f32
    %9 = vector.broadcast %cst_8 : f32 to vector<2x2xf32>
    %10 = arith.maximumf %8, %9 : vector<2x2xf32>
    %c0_9 = arith.constant 0 : index
    %c0_10 = arith.constant 0 : index
    %11 = vector.load %arg4[%c0_9, %c0_10] : memref<2x4xf32, #tpu.memory_space<vmem>>, vector<2x4xf32>
    %cst_11 = arith.constant dense<0.000000e+00> : vector<2x4xf32>
    %12 = tpu.matmul %10, %11, %cst_11 {dimension_numbers = #tpu.dot_dimension_numbers<[1], [0], [0], [1], [0, 0, 1, 1], [], []>} : vector<2x2xf32>, vector<2x4xf32>, vector<2x4xf32> -> vector<2x4xf32>
    %c0_12 = arith.constant 0 : index
    %c0_13 = arith.constant 0 : index
    %13 = vector.load %arg5[%c0_12, %c0_13] : memref<1x4xf32, #tpu.memory_space<vmem>>, vector<1x4xf32>
    %14 = vector.broadcast %13 : vector<1x4xf32> to vector<2x4xf32>
    %15 = arith.addf %12, %14 : vector<2x4xf32>
    %16 = arith.negf %15 : vector<2x4xf32>
    %17 = math.exp %16 : vector<2x4xf32>
    %cst_14 = arith.constant 1.000000e+00 : f32
    %18 = vector.broadcast %cst_14 : f32 to vector<2x4xf32>
    %19 = arith.addf %18, %17 : vector<2x4xf32>
    %20 = arith.divf %18, %19 : vector<2x4xf32>
    %21 = vector.shape_cast %20 : vector<2x4xf32> to vector<2x4x1xf32>
    %22 = vector.broadcast %21 : vector<2x4x1xf32> to vector<2x4x256xf32>
    %23 = arith.mulf %0, %22 : vector<2x4x256xf32>
    %c0_15 = arith.constant 0 : index
    %c0_16 = arith.constant 0 : index
    %c0_17 = arith.constant 0 : index
    %24 = vector.load %arg6[%c0_15, %c0_16, %c0_17] : memref<2x4x256xf32, #tpu.memory_space<vmem>>, vector<2x4x256xf32>
    tpu.vector_store %arg6[%c0_15, %c0_16, %c0_17], %23 {strides = array<i32>} : memref<2x4x256xf32, #tpu.memory_space<vmem>>, vector<2x4x256xf32>,
    return
  }
  func.func @transform_0(%arg0: i32) -> (i32, i32, i32) {
    %c0_i32 = arith.constant 0 : i32
    %c0_i32_0 = arith.constant 0 : i32
    %c0_i32_1 = arith.constant 0 : i32
    return %arg0, %c0_i32, %c0_i32_0 : i32, i32, i32
  }
  func.func @transform_1(%arg0: i32) -> (i32, i32) {
    %c0_i32 = arith.constant 0 : i32
    %c0_i32_0 = arith.constant 0 : i32
    %c0_i32_1 = arith.constant 0 : i32
    return %c0_i32, %c0_i32_0 : i32, i32
  }
  func.func @transform_2(%arg0: i32) -> (i32, i32) {
    %c0_i32 = arith.constant 0 : i32
    %c0_i32_0 = arith.constant 0 : i32
    %c0_i32_1 = arith.constant 0 : i32
    return %c0_i32, %c0_i32_0 : i32, i32
  }
  func.func @transform_3(%arg0: i32) -> (i32, i32) {
    %c0_i32 = arith.constant 0 : i32
    %c0_i32_0 = arith.constant 0 : i32
    %c0_i32_1 = arith.constant 0 : i32
    return %c0_i32, %c0_i32_0 : i32, i32
  }
  func.func @transform_4(%arg0: i32) -> (i32, i32) {
    %c0_i32 = arith.constant 0 : i32
    %c0_i32_0 = arith.constant 0 : i32
    %c0_i32_1 = arith.constant 0 : i32
    return %c0_i32, %c0_i32_0 : i32, i32
  }
  func.func @transform_5(%arg0: i32) -> (i32, i32, i32) {
    %c0_i32 = arith.constant 0 : i32
    %c0_i32_0 = arith.constant 0 : i32
    %c0_i32_1 = arith.constant 0 : i32
    return %arg0, %c0_i32, %c0_i32_0 : i32, i32, i32
  }
}

</mosaic_0001>

<bundles_post_ra>
// kernel: tpu_custom_call.1
= control target key start
LH: loop header
LB: loop body
LE: loop exit
PB: predicated region body
PF: predicated region fallthrough
CT: control target
= control target key end

     0   :  { %10 = vsyncpa [#allocation3], 0  ;;  %s479_s0 = inlined_call_operand.hbm [shape: f32[2,4,256], index: 0, kind: input, shape index: {}]   ;;  %s480_s1 = inlined_call_operand.vmem [shape: f32[4,2], index: 1, kind: input, shape index: {}]   ;;  %s481_s2 = inlined_call_operand.vmem [shape: f32[1,2], index: 2, kind: input, shape index: {}]   ;;  %s482_s3 = inlined_call_operand.vmem [shape: f32[2,4], index: 3, kind: input, shape index: {}]   ;;  %s483_s4 = inlined_call_operand.vmem [shape: f32[1,4], index: 4, kind: input, shape index: {}]   ;;  %s484_s5 = inlined_call_operand.hbm [shape: f32[2,4,256], index: 5, kind: output, shape index: {}]  }
   0x1   :  { %11 = vsyncpa [#allocation4], 0  ;;  %s383_s18 = smov [#allocation2]   ;;  %s335_s22 = scalar_lea.hbm %s479_s0, 256 }
   0x2   :  { %s17_s19 = sshll.u32 %s383_s18, 4  ;;  %p336_p0 = scmp.ne.s32.totalorder %s479_s0, %s335_s22  ;;  %s18_s19 = int_to_ptr.vmem [resolvable:$true] %s17_s19 }
   0x3   :  { %p339_p1 = scmp.lt.u32.totalorder %s335_s22, %s479_s0 }
   0x5   :  { %p341_p2 = pnand %p339_p1, %p336_p0 }
   0x7   :  { %344 = shalt.err (!%p341_p2)
}
   0x8   :  { %s345_s27 = scalar_lea.vmem %s18_s19, 256  ;;  %p350_p4 = scmp.lt.s32.totalorder %s18_s19, %s18_s19 }
   0x9   :  { %p346_p3 = scmp.ne.s32.totalorder %s18_s19, %s345_s27  ;;  %p351_p5 = scmp.lt.s32.totalorder %s345_s27, %s345_s27 }
   0xb   :  { %p352_p6 = por %p351_p5, %p350_p4 }
   0xd   :  { %p353_p7 = pnand %p352_p6, %p346_p3 }
   0xf   :  { %356 = shalt.err (!%p353_p7)
}
  0x10   :  { %s384_s28 = smov 128   ;;  %s385_s29 = smov 8  }
  0x11   :  { %23 = dma.hbm_to_vmem [thread:$0]  %s479_s0, 256, %s18_s19, [#allocation3], %s384_s28, %s384_s28, %s385_s29  }
  0x12   :  { %379 = dma.done.wait [#allocation3], 256  }
  0x13   :  { %380 = vsyncadd [#allocation3], 4294967040  ;;  %vm43_vm0 = vcmask 1043456   ;;  %v435_v0 = vld [vmem:[#allocation2] sm:$0xff]  ;;  %v437_v1 = vld [vmem:[#allocation2 + $0x8] sm:$0xff]  ;;  %v386_v11 = vmov 0.0   ;;  %v67_v12 = vlaneseq }
  0x14   :  { %v39_v2 = vcombine.high %v435_v0, %v435_v0  ;;  %v44_v3 = vsel %vm43_vm0, %v435_v0, 0.0  ;;  %v40_v4 = vcombine.high %v437_v1, %v437_v1  ;;  %v49_v6 = vsel %vm43_vm0, %v437_v1, 0.0  ;;  %v57_v10 = vld [vmem:[%s480_s1] sm:$0xf]  ;;  %312 = vmatprep.subr.mxu0 %v386_v11  ;;  %317 = vmatprep.subr.mxu1 %v386_v11 }
  0x15   :  { %vm387_vm1 = vmmov 0   ;;  %313 = vmatpush3.msk.msra.mxu0 %vm43_vm0, %v57_v10  ;;  %v68_v13 = vand.u32 127, %v67_v12  ;;  %v70_v14 = vshrl.u32 %v67_v12, 7  ;;  %vm77_vm2 = vcmask 1041409   ;;  %v156_v23 = vld [vmem:[%s482_s3] sm:$0x3] }
  0x16   :  { %v45_v5 = vsel %vm43_vm0, %v39_v2, 0.0  ;;  %v50_v7 = vsel %vm43_vm0, %v40_v4, 0.0  ;;  %314 = vmatprep.mubr.msk.f32.mxu0 %vm387_vm1, %v386_v11  ;;  %319 = vmatprep.mubr.msk.f32.mxu1 %vm387_vm1, %v386_v11  ;;  %vm79_vm3 = vcmask 31744   ;;  %vm168_vm4 = vcmask 1041408   ;;  %v301_v24 = vld [vmem:[%s481_s2] ss:$0 sm:$0xff] }
  0x17   :  { %v46_v8 = vadd.f32 %v45_v5, %v44_v3  ;;  %v51_v9 = vadd.f32 %v50_v7, %v49_v6  ;;  %v71_v16 = vsub.s32 %v68_v13, %v70_v14  ;;  %318 = vmatpush3.msk.msra.mxu1 %vm168_vm4, %v156_v23  ;;  %vm164_vm5 = vcmask 15360   ;;  %v304_v29 = vld [vmem:[%s483_s4] ss:$0 sm:$0xff]  ;;  %s389_s2 = smov [#allocation5]  }
  0x18   :  { %v250_v36 = vsub.s32 0, %v70_v14  ;;  %v257_v39 = vsub.s32 1, %v70_v14  ;;  %v388_v41 = vmov 839922192   ;;  %s289_s3 = sshll.u32 %s389_s2, 4  ;;  %s290_s3 = int_to_ptr.vmem [resolvable:$true] %s289_s3 }
  0x19   :  { %47 = vadd.xlane.f32.xlu0 %v46_v8  ;;  %v265_v42 = vunpack.c.l.s4 %v388_v41  ;;  %s357_s4 = scalar_lea.vmem %s290_s3, 256  ;;  %p362_p9 = scmp.lt.s32.totalorder %s290_s3, %s290_s3 }
  0x1a   :  { %p358_p8 = scmp.ne.s32.totalorder %s290_s3, %s357_s4  ;;  %p363_p10 = scmp.lt.s32.totalorder %s357_s4, %s357_s4 }
  0x1b   :  { %v266_v43 = vunpack.c.0.s8 %v265_v42 }
  0x1c   :  { %p364_p11 = por %p363_p10, %p362_p9 }
  0x1d   :  { %52 = vadd.xlane.f32.xlu0 %v51_v9  ;;  %v269_v44 = vsub.s32 %v266_v43, %v70_v14 }
  0x1e   :  { %p365_p12 = pnand %p364_p11, %p358_p8 }
  0xa6   :  { %v48_v15 = vpop.xlane.xlu0 %47 }
  0xa7   :  { %v55_v17 = vmul.f32 0.00390625, %v48_v15 }
  0xa9   :  { %v72_v20 = vrot.slane %v55_v17, %v71_v16 }
  0xaa   :  { %v53_v18 = vpop.xlane.xlu0 %52 }
  0xab   :  { %v56_v19 = vmul.f32 0.00390625, %v53_v18 }
  0xad   :  { %v76_v21 = vrot.slane %v56_v19, %v71_v16 }
  0xaf   :  { %v78_v22 = vsel %vm77_vm2, %v76_v21, %v72_v20 }
  0xb0   :  { %315 = vmatmul.mubr.msk.f32.vlgmr.msra.gmra.mrb[0].mxu0 %vm79_vm3, %v78_v22 }
 0x183   :  { %v151_v25 = vpop.f32.mrb[0].mxu0 }
 0x184   :  { %v152_v26 = vadd.f32 %v301_v24, %v151_v25  ;;  %v316_v27 = vpop.f32.mrb[1].mxu0 }
 0x186   :  { %v155_v28 = vmax.f32 %v152_v26, 0.0 }
 0x188   :  { %320 = vmatmul.mubr.msk.f32.vlgmr.msra.gmra.mrb[0].mxu1 %vm164_vm5, %v155_v28 }
 0x25b   :  { %v238_v30 = vpop.f32.mrb[0].mxu1 }
 0x25c   :  { %v239_v31 = vadd.f32 %v304_v29, %v238_v30  ;;  %v321_v32 = vpop.f32.mrb[1].mxu1 }
 0x25e   :  { %v307_v33 = vmul.f32 -1.442695, %v239_v31 }
 0x260   :  { %331 = vpow2.f32 %v307_v33 }
 0x26a   :  { %v332_v34 = vpop.eup %331 }
 0x26b   :  { %v245_v35 = vadd.f32 1.0, %v332_v34 }
 0x26d   :  { %333 = vrcp.f32 %v245_v35 }
 0x277   :  { %v334_v37 = vpop.eup %333 }
 0x278   :  { %v251_v38 = vrot.slane %v334_v37, %v250_v36  ;;  %v258_v40 = vrot.slane %v334_v37, %v257_v39 }
 0x27a   :  { %253 = vbcast.lane.b32.xlu1 %v251_v38, 256 }
 0x27e   :  { %260 = vbcast.lane.b32.xlu1 %v258_v40, 256 }
 0x2ec   :  { %v254_v45 = vpop.permute.xlu1 %253 }
 0x2ed   :  { %v270_v46 = vrot.slane %v254_v45, %v269_v44 }
 0x2ef   :  { %v280_v47 = vmul.f32 %v270_v46, %v435_v0 }
 0x2f0   :  { %v261_v48 = vpop.permute.xlu1 %260 }
 0x2f1   :  { %282 = vst [vmem:[#allocation5] sm:$0xff] %v280_v47  ;;  %v277_v49 = vrot.slane %v261_v48, %v269_v44 }
 0x2f3   :  { %v281_v50 = vmul.f32 %v277_v49, %v437_v1 }
 0x2f5   :  { %283 = vst [vmem:[#allocation5 + $0x8] sm:$0xff] %v281_v50 }
 0x2f6   :  { %368 = shalt.err (!%p365_p12)
}
 0x2f7   :  { %s369_s15 = scalar_lea.hbm %s484_s5, 256 }
 0x2f8   :  { %p370_p13 = scmp.ne.s32.totalorder %s484_s5, %s369_s15  ;;  %p373_p0 = scmp.lt.u32.totalorder %s369_s15, %s484_s5 }
 0x2fa   :  { %p375_p1 = pnand %p373_p0, %p370_p13 }
 0x2fc   :  { %378 = shalt.err (!%p375_p1)
}
 0x2fd   :  { %295 = dma.vmem_to_hbm [thread:$0]  %s290_s3, 256, %s484_s5, [#allocation4], %s384_s28, %s384_s28, %s385_s29  }
 0x2fe   :  { %381 = dma.done.wait [#allocation4], 256  }
 0x2ff   :  { %382 = vsyncadd [#allocation4], 4294967040 }
 0x300   :  { %299 = vsyncpa [#allocation3], 1 }
 0x301   :  { %300 = vsyncpa [#allocation4], 1 }

</bundles_post_ra>
